<compile_context>
chip_gen: v7x
topology: tpu7x:2x2x1
jax: 0.10.0
libtpu: 0.0.40
codegen_flags: <defaults>
</compile_context>

<pallas_src>
import functools

import jax
import jax.numpy as jnp
from jax.experimental import pallas as pl
from jax.experimental.pallas import tpu as pltpu

EPS = 1e-5  # torch.nn.LayerNorm default


def _round_up(n, m):
    return ((n + m - 1) // m) * m


def _make_prenorm_kernel(d_true, d_pad):
    """Build the fused LayerNorm + Linear kernel for a given (true, padded) D."""
    use_mask = d_pad != d_true
    inv_d = 1.0 / float(d_true)

    def kernel(x_ref, w_ref, b_ref, o_ref):
        # x_ref: (TR, Dp) row tile, w_ref: (Dp, TN), b_ref: (1, TN)
        x = x_ref[...].astype(jnp.float32)

        # LayerNorm stats over the TRUE feature count (padded cols are zero,
        # so the raw sum is already correct; the mask only fixes `centered`
        # before the variance reduction).
        mean = jnp.sum(x, axis=-1, keepdims=True) * inv_d
        centered = x - mean
        if use_mask:
            col = jax.lax.broadcasted_iota(jnp.int32, x.shape, 1)
            centered = jnp.where(col < d_true, centered, 0.0)
        var = jnp.sum(centered * centered, axis=-1, keepdims=True) * inv_d
        xn = centered * jax.lax.rsqrt(var + EPS)

        # fn = Linear: xn @ W' + b'  (gamma/beta already folded into W'/b').
        out = jnp.dot(xn.astype(w_ref.dtype), w_ref[...],
                      preferred_element_type=jnp.float32)
        out = out + b_ref[...].astype(jnp.float32)
        o_ref[...] = out.astype(o_ref.dtype)

    return kernel


@functools.partial(jax.jit, static_argnames=("tile_rows", "block_cols"))
def prenorm_linear(x, gamma, beta, w, wb, *, tile_rows=256, block_cols=None):
    """x: (B, S, D) -> fn(LayerNorm(x)) with fn = Linear(D, D).

    tile_rows:  max rows of x processed per grid step (shrunk automatically
                for small inputs to avoid padding waste).
    block_cols: optional output-column tile for the weight (use on VMEM-tight
                parts, e.g. v7x with large D); None keeps W fully resident.
    """
    B, S, D = x.shape
    R = B * S

    Dp = _round_up(D, 128)
    # Adaptive row tile: never pad small inputs up to a huge tile.
    TR = min(int(tile_rows), _round_up(R, 8))
    TR = max(_round_up(TR, 8), 8)
    Rp = _round_up(R, TR)
    if block_cols is None:
        TN = Dp
    else:
        TN = min(_round_up(int(block_cols), 128), Dp)
        assert Dp % TN == 0, "block_cols (rounded to 128) must divide padded D"

    f32 = jnp.float32
    # Fold the LayerNorm affine into the linear layer (done once, outside the
    # kernel):  (xn*gamma + beta) @ W + wb  ==  xn @ (gamma[:,None]*W) + (beta@W + wb)
    w_f = (gamma.astype(f32)[:, None] * w.astype(f32)).astype(w.dtype)
    b_f = (beta.astype(f32) @ w.astype(f32) + wb.astype(f32))

    # Pad rows / features to tile- and lane-friendly sizes only if needed
    # (zeros are benign: padded W rows/cols and bias entries are zero, padded
    # output rows/cols are sliced off).
    x2 = x.reshape(R, D)
    if Rp != R or Dp != D:
        x2 = jnp.pad(x2, ((0, Rp - R), (0, Dp - D)))
    wp = jnp.pad(w_f, ((0, Dp - D), (0, Dp - D))) if Dp != D else w_f
    bp = (jnp.pad(b_f, (0, Dp - D)) if Dp != D else b_f).reshape(1, Dp)

    kernel = _make_prenorm_kernel(D, Dp)

    out2 = pl.pallas_call(
        kernel,
        out_shape=jax.ShapeDtypeStruct((Rp, Dp), x.dtype),
        grid_spec=pltpu.PrefetchScalarGridSpec(
            num_scalar_prefetch=0,
            # Column axis is the inner grid axis: the x row tile's block index
            # is unchanged across it, so it is not re-fetched.
            grid=(Rp // TR, Dp // TN),
            in_specs=[
                pl.BlockSpec((TR, Dp), lambda i, j: (i, 0)),   # x row tile
                pl.BlockSpec((Dp, TN), lambda i, j: (0, j)),   # fused weight
                pl.BlockSpec((1, TN), lambda i, j: (0, j)),    # fused bias
            ],
            out_specs=pl.BlockSpec((TR, TN), lambda i, j: (i, j)),
        ),
        compiler_params=pltpu.CompilerParams(
            dimension_semantics=("parallel", "parallel")),
    )(x2, wp, bp)

    if Rp != R or Dp != D:
        out2 = out2[:R, :D]
    return out2.reshape(B, S, D)


def prenorm_linear_ref(x, gamma, beta, w, wb):
    xf = x.astype(jnp.float32)
    mean = jnp.mean(xf, axis=-1, keepdims=True)
    var = jnp.mean((xf - mean) ** 2, axis=-1, keepdims=True)
    xn = (xf - mean) / jnp.sqrt(var + EPS)
    y = xn * gamma.astype(jnp.float32) + beta.astype(jnp.float32)
    return (y @ w.astype(jnp.float32) + wb.astype(jnp.float32)).astype(x.dtype)


if __name__ == "__main__":
    B, S, D = 2, 8, 32
    key = jax.random.PRNGKey(0)
    kx, kw, kb, kg, kbe = jax.random.split(key, 5)

    x = jax.random.normal(kx, (B, S, D), dtype=jnp.float32)

    # LayerNorm affine params (non-trivial, to exercise the gamma/beta fold)
    gamma = 1.0 + 0.1 * jax.random.normal(kg, (D,), dtype=jnp.float32)
    beta = 0.1 * jax.random.normal(kbe, (D,), dtype=jnp.float32)
    # fn = Linear(D, D)
    w = jax.random.normal(kw, (D, D), dtype=jnp.float32) * (1.0 / jnp.sqrt(D))
    wb = jax.random.normal(kb, (D,), dtype=jnp.float32) * 0.01

    out = prenorm_linear(x, gamma, beta, w, wb)
    jax.block_until_ready(out)

    ref = prenorm_linear_ref(x, gamma, beta, w, wb)
    assert out.shape == (B, S, D)
    assert jnp.max(jnp.abs(out - ref)) < 1e-3, "mismatch vs reference"

    print("KERNEL_OK")
</pallas_src>

<mosaic_0001>
module attributes {stable_mosaic.version = 11 : i64} {
  func.func @kernel(%arg0: i32, %arg1: i32, %arg2: memref<16x128xf32, #tpu.memory_space<vmem>>, %arg3: memref<128x128xf32, #tpu.memory_space<vmem>>, %arg4: memref<1x128xf32, #tpu.memory_space<vmem>>, %arg5: memref<16x128xf32, #tpu.memory_space<vmem>>) attributes {dimension_semantics = [#tpu.dimension_semantics<parallel>, #tpu.dimension_semantics<parallel>], iteration_bounds = array<i64: 1, 1>, scalar_prefetch = 0 : i64, scratch_operands = 0 : i64, tpu.core_type = #tpu.core_type<tc>, window_params = [{transform_indices = @transform_0, window_bounds = array<i64: 16, 128>}, {transform_indices = @transform_1, window_bounds = array<i64: 128, 128>}, {transform_indices = @transform_2, window_bounds = array<i64: 1, 128>}, {transform_indices = @transform_3, window_bounds = array<i64: 16, 128>}]} {
    %c0 = arith.constant 0 : index
    %c0_0 = arith.constant 0 : index
    %0 = vector.load %arg2[%c0, %c0_0] : memref<16x128xf32, #tpu.memory_space<vmem>>, vector<16x128xf32>
    %cst = arith.constant dense<0.000000e+00> : vector<16xf32>
    %1 = vector.multi_reduction <add>, %0, %cst [1] : vector<16x128xf32> to vector<16xf32>
    %2 = vector.shape_cast %1 : vector<16xf32> to vector<16x1xf32>
    %cst_1 = arith.constant 3.125000e-02 : f32
    %3 = vector.broadcast %cst_1 : f32 to vector<16x1xf32>
    %4 = arith.mulf %2, %3 : vector<16x1xf32>
    %5 = vector.broadcast %4 : vector<16x1xf32> to vector<16x128xf32>
    %6 = arith.subf %0, %5 : vector<16x128xf32>
    %7 = tpu.iota {dimensions = array<i32: 1>} : vector<16x128xi32>
    %c32_i32 = arith.constant 32 : i32
    %8 = vector.broadcast %c32_i32 : i32 to vector<16x128xi32>
    %9 = arith.cmpi slt, %7, %8 : vector<16x128xi32>
    %cst_2 = arith.constant 0.000000e+00 : f32
    %10 = vector.broadcast %cst_2 : f32 to vector<16x128xf32>
    %11 = arith.select %9, %6, %10 : vector<16x128xi1>, vector<16x128xf32>
    %12 = arith.mulf %11, %11 : vector<16x128xf32>
    %cst_3 = arith.constant dense<0.000000e+00> : vector<16xf32>
    %13 = vector.multi_reduction <add>, %12, %cst_3 [1] : vector<16x128xf32> to vector<16xf32>
    %14 = vector.shape_cast %13 : vector<16xf32> to vector<16x1xf32>
    %cst_4 = arith.constant 3.125000e-02 : f32
    %15 = vector.broadcast %cst_4 : f32 to vector<16x1xf32>
    %16 = arith.mulf %14, %15 : vector<16x1xf32>
    %cst_5 = arith.constant 9.99999974E-6 : f32
    %17 = vector.broadcast %cst_5 : f32 to vector<16x1xf32>
    %18 = arith.addf %16, %17 : vector<16x1xf32>
    %19 = math.rsqrt %18 : vector<16x1xf32>
    %20 = vector.broadcast %19 : vector<16x1xf32> to vector<16x128xf32>
    %21 = arith.mulf %11, %20 : vector<16x128xf32>
    %c0_6 = arith.constant 0 : index
    %c0_7 = arith.constant 0 : index
    %22 = vector.load %arg3[%c0_6, %c0_7] : memref<128x128xf32, #tpu.memory_space<vmem>>, vector<128x128xf32>
    %cst_8 = arith.constant dense<0.000000e+00> : vector<16x128xf32>
    %23 = tpu.matmul %21, %22, %cst_8 {dimension_numbers = #tpu.dot_dimension_numbers<[1], [0], [0], [1], [0, 0, 1, 1], [], []>} : vector<16x128xf32>, vector<128x128xf32>, vector<16x128xf32> -> vector<16x128xf32>
    %c0_9 = arith.constant 0 : index
    %c0_10 = arith.constant 0 : index
    %24 = vector.load %arg4[%c0_9, %c0_10] : memref<1x128xf32, #tpu.memory_space<vmem>>, vector<1x128xf32>
    %25 = vector.broadcast %24 : vector<1x128xf32> to vector<16x128xf32>
    %26 = arith.addf %23, %25 : vector<16x128xf32>
    %c0_11 = arith.constant 0 : index
    %c0_12 = arith.constant 0 : index
    %27 = vector.load %arg5[%c0_11, %c0_12] : memref<16x128xf32, #tpu.memory_space<vmem>>, vector<16x128xf32>
    tpu.vector_store %arg5[%c0_11, %c0_12], %26 {strides = array<i32>} : memref<16x128xf32, #tpu.memory_space<vmem>>, vector<16x128xf32>,
    return
  }
  func.func @transform_0(%arg0: i32, %arg1: i32) -> (i32, i32) {
    %c0_i32 = arith.constant 0 : i32
    %c0_i32_0 = arith.constant 0 : i32
    return %arg0, %c0_i32 : i32, i32
  }
  func.func @transform_1(%arg0: i32, %arg1: i32) -> (i32, i32) {
    %c0_i32 = arith.constant 0 : i32
    %c0_i32_0 = arith.constant 0 : i32
    return %c0_i32, %arg1 : i32, i32
  }
  func.func @transform_2(%arg0: i32, %arg1: i32) -> (i32, i32) {
    %c0_i32 = arith.constant 0 : i32
    %c0_i32_0 = arith.constant 0 : i32
    return %c0_i32, %arg1 : i32, i32
  }
  func.func @transform_3(%arg0: i32, %arg1: i32) -> (i32, i32) {
    %c0_i32 = arith.constant 0 : i32
    return %arg0, %arg1 : i32, i32
  }
}

</mosaic_0001>

<bundles_post_ra>
// kernel: prenorm_linear.1
= control target key start
LH: loop header
LB: loop body
LE: loop exit
PB: predicated region body
PF: predicated region fallthrough
CT: control target
= control target key end

     0   :  { %v24_v11 = vlaneseq  ;;  %s320_s0 = inlined_call_operand.vmem [shape: f32[16,128], index: 0, kind: input, shape index: {}]   ;;  %s321_s1 = inlined_call_operand.vmem [shape: f32[128,128], index: 1, kind: input, shape index: {}]   ;;  %s322_s2 = inlined_call_operand.vmem [shape: f32[1,128], index: 2, kind: input, shape index: {}]   ;;  %s323_s3 = inlined_call_operand.vmem [shape: f32[16,128], index: 3, kind: output, shape index: {}]  }
   0x1   :  { %v14_v0 = vld [vmem:[%s320_s0] sm:$0xff]  ;;  %v15_v1 = vld [vmem:[%s320_s0 + $0x8] sm:$0xff]  ;;  %v45_v4 = vld [vmem:[%s321_s1 + $0x10] sm:$0xff] }
   0x2   :  { %16 = vadd.xlane.f32.xlu0 %v14_v0  ;;  %v43_v2 = vld [vmem:[%s321_s1] sm:$0xff]  ;;  %v44_v3 = vld [vmem:[%s321_s1 + $0x8] sm:$0xff]  ;;  %v46_v6 = vld [vmem:[%s321_s1 + $0x18] sm:$0xff]  ;;  %v25_v12 = vand.u32 127, %v24_v11 }
   0x3   :  { %v201_v5 = vpack.c.bf16 %v44_v3, %v43_v2  ;;  %v205_v7 = vpack.c.bf16 %v46_v6, %v45_v4  ;;  %v47_v8 = vld [vmem:[%s321_s1 + $0x20] sm:$0xff]  ;;  %v48_v9 = vld [vmem:[%s321_s1 + $0x28] sm:$0xff]  ;;  %v49_v23 = vld [vmem:[%s321_s1 + $0x30] sm:$0xff] }
   0x4   :  { %v209_v10 = vpack.c.bf16 %v48_v9, %v47_v8  ;;  %vm26_vm0 = vcmp.lt.s32.totalorder %v25_v12, 32  ;;  %v50_v24 = vld [vmem:[%s321_s1 + $0x38] sm:$0xff]  ;;  %v51_v26 = vld [vmem:[%s321_s1 + $0x40] sm:$0xff]  ;;  %v52_v27 = vld [vmem:[%s321_s1 + $0x48] sm:$0xff] }
   0x5   :  { %202 = vmatprep.subr.bf16.mxu0 %v201_v5  ;;  %v213_v25 = vpack.c.bf16 %v50_v24, %v49_v23  ;;  %v217_v28 = vpack.c.bf16 %v52_v27, %v51_v26  ;;  %v53_v29 = vld [vmem:[%s321_s1 + $0x50] sm:$0xff]  ;;  %v54_v30 = vld [vmem:[%s321_s1 + $0x58] sm:$0xff]  ;;  %v55_v32 = vld [vmem:[%s321_s1 + $0x60] sm:$0xff] }
   0x6   :  { %18 = vadd.xlane.f32.xlu0 %v15_v1  ;;  %204 = vmatpush3.bf16.msra.mxu0 %v201_v5  ;;  %v221_v31 = vpack.c.bf16 %v54_v30, %v53_v29  ;;  %v56_v33 = vld [vmem:[%s321_s1 + $0x68] sm:$0xff]  ;;  %v57_v34 = vld [vmem:[%s321_s1 + $0x70] sm:$0xff]  ;;  %v58_v36 = vld [vmem:[%s321_s1 + $0x78] sm:$0xff] }
   0x7   :  { %206 = vmatprep.subr.bf16.mxu0 %v205_v7  ;;  %v225_v35 = vpack.c.bf16 %v56_v33, %v55_v32  ;;  %v229_v37 = vpack.c.bf16 %v58_v36, %v57_v34  ;;  %v147_v48 = vld [vmem:[%s322_s2] ss:$0 sm:$0xff] }
   0xa   :  { %208 = vmatpush3.bf16.msra.mxu0 %v205_v7 }
   0xb   :  { %210 = vmatprep.subr.bf16.mxu0 %v209_v10 }
   0xe   :  { %212 = vmatpush3.bf16.msra.mxu0 %v209_v10 }
   0xf   :  { %214 = vmatprep.subr.bf16.mxu0 %v213_v25 }
  0x12   :  { %216 = vmatpush3.bf16.msra.mxu0 %v213_v25 }
  0x13   :  { %218 = vmatprep.subr.bf16.mxu0 %v217_v28 }
  0x16   :  { %220 = vmatpush3.bf16.msra.mxu0 %v217_v28 }
  0x17   :  { %222 = vmatprep.subr.bf16.mxu0 %v221_v31 }
  0x1a   :  { %224 = vmatpush3.bf16.msra.mxu0 %v221_v31 }
  0x1b   :  { %226 = vmatprep.subr.bf16.mxu0 %v225_v35 }
  0x1e   :  { %228 = vmatpush3.bf16.msra.mxu0 %v225_v35 }
  0x1f   :  { %230 = vmatprep.subr.bf16.mxu0 %v229_v37 }
  0x22   :  { %232 = vmatpush3.bf16.msra.mxu0 %v229_v37 }
  0x8f   :  { %v17_v13 = vpop.xlane.xlu0 %16 }
  0x90   :  { %v20_v14 = vmul.f32 0.03125, %v17_v13 }
  0x92   :  { %v22_v15 = vsub.f32 %v14_v0, %v20_v14 }
  0x93   :  { %v19_v16 = vpop.xlane.xlu0 %18 }
  0x94   :  { %v21_v17 = vmul.f32 0.03125, %v19_v16  ;;  %v27_v18 = vsel %vm26_vm0, %v22_v15, 0.0 }
  0x95   :  { %v29_v19 = vmul.f32 %v27_v18, %v27_v18 }
  0x96   :  { %v23_v20 = vsub.f32 %v15_v1, %v21_v17 }
  0x97   :  { %31 = vadd.xlane.f32.xlu1 %v29_v19 }
  0x98   :  { %v28_v21 = vsel %vm26_vm0, %v23_v20, 0.0 }
  0x99   :  { %v30_v22 = vmul.f32 %v28_v21, %v28_v21 }
  0x9b   :  { %33 = vadd.xlane.f32.xlu1 %v30_v22 }
 0x124   :  { %v32_v38 = vpop.xlane.xlu1 %31 }
 0x125   :  { %v35_v39 = vmul.f32 0.03125, %v32_v38 }
 0x127   :  { %v37_v40 = vadd.f32 1e-05, %v35_v39 }
 0x128   :  { %v34_v41 = vpop.xlane.xlu1 %33 }
 0x129   :  { %233 = vrsqrt.f32 %v37_v40  ;;  %v36_v42 = vmul.f32 0.03125, %v34_v41 }
 0x12b   :  { %v38_v43 = vadd.f32 1e-05, %v36_v42 }
 0x12d   :  { %235 = vrsqrt.f32 %v38_v43 }
 0x133   :  { %v234_v44 = vpop.eup %233 }
 0x134   :  { %v41_v45 = vmul.f32 %v234_v44, %v27_v18 }
 0x136   :  { %198 = vmatprep.mubr.f32.mxu0 %v41_v45 }
 0x137   :  { %v236_v46 = vpop.eup %235 }
 0x138   :  { %v42_v47 = vmul.f32 %v236_v46, %v28_v21 }
 0x13a   :  { %199 = vmatmul.mubr.f32.vlgmr.msra.gmra.mrb[0].mxu0 %v42_v47 }
 0x20d   :  { %v200_v49 = vpop.f32.mrb[0].mxu0 }
 0x20e   :  { %v138_v50 = vadd.f32 %v200_v49, %v147_v48  ;;  %v132_v51 = vpop.f32.mrb[1].mxu0 }
 0x20f   :  { %v133_v52 = vadd.f32 %v147_v48, %v132_v51 }
 0x210   :  { %142 = vst [vmem:[%s323_s3 + $0x8] sm:$0xff] %v138_v50 }
 0x211   :  { %141 = vst [vmem:[%s323_s3] sm:$0xff] %v133_v52 }

</bundles_post_ra>
